<compile_context>
chip_gen: v6e
topology: v6e:2x2x1
jax: 0.10.0
libtpu: 0.0.40
codegen_flags: <defaults>
</compile_context>

<pallas_src>
import functools

import jax
import jax.numpy as jnp
from jax.experimental import pallas as pl
from jax.experimental.pallas import tpu as pltpu


def _round_up(x, m):
    return (x + m - 1) // m * m


def _ff_kernel(x_ref, w1_ref, b1_ref, w2_ref, b2_ref, o_ref, acc_ref):
    # x_ref : (tile_rows, d_model)      w1_ref: (d_model, tile_k)   b1_ref: (1, tile_k)
    # w2_ref: (tile_k,  d_out)          b2_ref: (1, d_out)
    # o_ref : (tile_rows, d_out)        acc_ref: (tile_rows, d_out) f32 scratch
    k = pl.program_id(1)

    @pl.when(k == 0)
    def _():
        acc_ref[...] = jnp.zeros_like(acc_ref)

    # First linear (block of the d_ff dimension) + bias + ReLU.  The d_model
    # contraction is complete inside this block, so per-block ReLU is exact.
    h = jnp.dot(x_ref[...], w1_ref[...], preferred_element_type=jnp.float32)
    h = jnp.maximum(h + b1_ref[...].astype(jnp.float32), 0.0)

    # Second linear: accumulate this d_ff block's contribution in f32.
    acc_ref[...] += jnp.dot(h.astype(w2_ref.dtype), w2_ref[...],
                            preferred_element_type=jnp.float32)

    @pl.when(k == pl.num_programs(1) - 1)
    def _():
        o_ref[...] = (acc_ref[...] + b2_ref[...].astype(jnp.float32)).astype(o_ref.dtype)


@functools.partial(jax.jit, static_argnames=("tile_rows", "tile_k", "use_bf16"))
def feedforward(x, w1, b1, w2, b2, *, tile_rows=256, tile_k=512, use_bf16=True):
    """x: (..., d_model) -> (..., output_dim). Eval-mode Feedforward.forward.

    w1: (d_model, d_ff), b1: (d_ff,), w2: (d_ff, output_dim), b2: (output_dim,)
    (weights stored transposed vs. PyTorch nn.Linear).
    """
    orig_shape = x.shape
    d_model = orig_shape[-1]
    d_ff = w1.shape[1]
    d_out = w2.shape[1]

    out_dtype = x.dtype
    mx_dtype = jnp.bfloat16 if use_bf16 else x.dtype
    mx_bytes = jnp.dtype(mx_dtype).itemsize
    out_bytes = jnp.dtype(out_dtype).itemsize

    x2 = x.reshape(-1, d_model)
    n_rows = x2.shape[0]

    # --- tile / padding geometry (all static) ---------------------------------
    tile_rows_eff = min(tile_rows, _round_up(n_rows, 8))      # sublane-aligned
    n_total = _round_up(n_rows, tile_rows_eff)
    dm_pad = _round_up(d_model, 128)                           # lane-dense x block
    tile_k_eff = min(tile_k, _round_up(d_ff, 128))             # d_ff streaming block
    dff_pad = _round_up(d_ff, tile_k_eff)
    do_pad = _round_up(d_out, 128)                             # lane-dense output

    # --- pad + cast operands (zero padding is numerically inert here) --------
    x2 = jnp.pad(x2, ((0, n_total - n_rows), (0, dm_pad - d_model))).astype(mx_dtype)
    w1p = jnp.pad(w1, ((0, dm_pad - d_model), (0, dff_pad - d_ff))).astype(mx_dtype)
    b1p = jnp.pad(b1.reshape(1, -1), ((0, 0), (0, dff_pad - d_ff))).astype(mx_dtype)
    w2p = jnp.pad(w2, ((0, dff_pad - d_ff), (0, do_pad - d_out))).astype(mx_dtype)
    b2p = jnp.pad(b2.reshape(1, -1), ((0, 0), (0, do_pad - d_out))).astype(jnp.float32)

    grid = (n_total // tile_rows_eff, dff_pad // tile_k_eff)

    # --- VMEM budget (double-buffered blocks + f32 accumulator + headroom) ---
    block_in_bytes = (tile_rows_eff * dm_pad + dm_pad * tile_k_eff + tile_k_eff
                      + tile_k_eff * do_pad) * mx_bytes + do_pad * 4
    block_out_bytes = tile_rows_eff * do_pad * out_bytes
    acc_bytes = tile_rows_eff * do_pad * 4
    vmem_est = 2 * (block_in_bytes + block_out_bytes) + acc_bytes
    vmem_limit = max(4 << 20, min(int(vmem_est * 1.5), 64 << 20))

    cost = pl.CostEstimate(
        flops=2 * n_total * dm_pad * dff_pad + 2 * n_total * dff_pad * do_pad,
        transcendentals=0,
        bytes_accessed=(x2.size + w1p.size + b1p.size + w2p.size) * mx_bytes
        + b2p.size * 4
        + n_total * do_pad * out_bytes,
    )

    out = pl.pallas_call(
        _ff_kernel,
        out_shape=jax.ShapeDtypeStruct((n_total, do_pad), out_dtype),
        grid_spec=pltpu.PrefetchScalarGridSpec(
            num_scalar_prefetch=0,
            grid=grid,
            in_specs=[
                pl.BlockSpec((tile_rows_eff, dm_pad), lambda i, k: (i, 0)),
                pl.BlockSpec((dm_pad, tile_k_eff), lambda i, k: (0, k)),
                pl.BlockSpec((1, tile_k_eff), lambda i, k: (0, k)),
                pl.BlockSpec((tile_k_eff, do_pad), lambda i, k: (k, 0)),
                pl.BlockSpec((1, do_pad), lambda i, k: (0, 0)),
            ],
            out_specs=pl.BlockSpec((tile_rows_eff, do_pad), lambda i, k: (i, 0)),
            scratch_shapes=[pltpu.VMEM((tile_rows_eff, do_pad), jnp.float32)],
        ),
        compiler_params=pltpu.CompilerParams(
            dimension_semantics=("parallel", "arbitrary"),
            vmem_limit_bytes=vmem_limit,
        ),
        cost_estimate=cost,
    )(x2, w1p, b1p, w2p, b2p)

    out = out[:n_rows, :d_out]
    return out.reshape(*orig_shape[:-1], d_out)


def init_params(key, d_model, d_ff, output_dim, dtype=jnp.float32):
    """PyTorch-Linear-style uniform init (bounds 1/sqrt(fan_in))."""
    k1, k2, k3, k4 = jax.random.split(key, 4)
    bound1 = 1.0 / (d_model ** 0.5)
    bound2 = 1.0 / (d_ff ** 0.5)
    w1 = jax.random.uniform(k1, (d_model, d_ff), dtype, -bound1, bound1)
    b1 = jax.random.uniform(k2, (d_ff,), dtype, -bound1, bound1)
    w2 = jax.random.uniform(k3, (d_ff, output_dim), dtype, -bound2, bound2)
    b2 = jax.random.uniform(k4, (output_dim,), dtype, -bound2, bound2)
    return w1, b1, w2, b2


if __name__ == "__main__":
    key = jax.random.PRNGKey(0)
    batch, seq, d_model, d_ff, output_dim = 2, 8, 32, 64, 32

    kx, kp = jax.random.split(key)
    x = jax.random.normal(kx, (batch, seq, d_model), dtype=jnp.float32)
    w1, b1, w2, b2 = init_params(kp, d_model, d_ff, output_dim)

    out = feedforward(x, w1, b1, w2, b2)
    out = jax.block_until_ready(out)

    # Pure-JAX f32 reference (eval-mode forward). bf16 MXU inputs with f32
    # accumulation -> slightly loosened tolerance.
    ref = jnp.maximum(x @ w1 + b1, 0.0) @ w2 + b2
    assert out.shape == (batch, seq, output_dim)
    assert jnp.allclose(out, ref, atol=3e-2, rtol=3e-2), float(jnp.max(jnp.abs(out - ref)))

    print("KERNEL_OK")
</pallas_src>

<mosaic_0001>
module attributes {stable_mosaic.version = 11 : i64} {
  func.func @_ff_kernel(%arg0: i32, %arg1: i32, %arg2: memref<16x128xbf16, #tpu.memory_space<vmem>>, %arg3: memref<128x128xbf16, #tpu.memory_space<vmem>>, %arg4: memref<1x128xbf16, #tpu.memory_space<vmem>>, %arg5: memref<128x128xbf16, #tpu.memory_space<vmem>>, %arg6: memref<1x128xf32, #tpu.memory_space<vmem>>, %arg7: memref<16x128xf32, #tpu.memory_space<vmem>>, %arg8: memref<16x128xf32, #tpu.memory_space<vmem>>) attributes {dimension_semantics = [#tpu.dimension_semantics<parallel>, #tpu.dimension_semantics<arbitrary>], iteration_bounds = array<i64: 1, 1>, scalar_prefetch = 0 : i64, scratch_operands = 1 : i64, tpu.core_type = #tpu.core_type<tc>, window_params = [{transform_indices = @transform_0, window_bounds = array<i64: 16, 128>}, {transform_indices = @transform_1, window_bounds = array<i64: 128, 128>}, {transform_indices = @transform_2, window_bounds = array<i64: 1, 128>}, {transform_indices = @transform_3, window_bounds = array<i64: 128, 128>}, {pipeline_mode = #tpu.pipeline_mode<synchronous>, transform_indices = @transform_4, window_bounds = array<i64: 1, 128>}, {transform_indices = @transform_5, window_bounds = array<i64: 16, 128>}]} {
    %c0_i32 = arith.constant 0 : i32
    %0 = arith.cmpi eq, %arg1, %c0_i32 : i32
    %1 = arith.extui %0 : i1 to i32
    %c0_i32_0 = arith.constant 0 : i32
    %2 = arith.cmpi ne, %1, %c0_i32_0 : i32
    scf.if %2 {
      %cst_16 = arith.constant 0.000000e+00 : f32
      %21 = vector.broadcast %cst_16 : f32 to vector<16x128xf32>
      %c0_17 = arith.constant 0 : index
      %c0_18 = arith.constant 0 : index
      %22 = vector.load %arg8[%c0_17, %c0_18] : memref<16x128xf32, #tpu.memory_space<vmem>>, vector<16x128xf32>
      tpu.vector_store %arg8[%c0_17, %c0_18], %21 {strides = array<i32>} : memref<16x128xf32, #tpu.memory_space<vmem>>, vector<16x128xf32>,
    } else {
    }
    %c0 = arith.constant 0 : index
    %c0_1 = arith.constant 0 : index
    %3 = vector.load %arg2[%c0, %c0_1] : memref<16x128xbf16, #tpu.memory_space<vmem>>, vector<16x128xbf16>
    %c0_2 = arith.constant 0 : index
    %c0_3 = arith.constant 0 : index
    %4 = vector.load %arg3[%c0_2, %c0_3] : memref<128x128xbf16, #tpu.memory_space<vmem>>, vector<128x128xbf16>
    %cst = arith.constant dense<0.000000e+00> : vector<16x128xf32>
    %5 = tpu.matmul %3, %4, %cst {dimension_numbers = #tpu.dot_dimension_numbers<[1], [0], [0], [1], [0, 0, 1, 1], [], []>} : vector<16x128xbf16>, vector<128x128xbf16>, vector<16x128xf32> -> vector<16x128xf32>
    %c0_4 = arith.constant 0 : index
    %c0_5 = arith.constant 0 : index
    %6 = vector.load %arg4[%c0_4, %c0_5] : memref<1x128xbf16, #tpu.memory_space<vmem>>, vector<1x128xbf16>
    %7 = arith.extf %6 : vector<1x128xbf16> to vector<1x128xf32>
    %8 = vector.broadcast %7 : vector<1x128xf32> to vector<16x128xf32>
    %9 = arith.addf %5, %8 : vector<16x128xf32>
    %cst_6 = arith.constant 0.000000e+00 : f32
    %10 = vector.broadcast %cst_6 : f32 to vector<16x128xf32>
    %11 = arith.maximumf %9, %10 : vector<16x128xf32>
    %c0_7 = arith.constant 0 : index
    %c0_8 = arith.constant 0 : index
    %12 = vector.load %arg8[%c0_7, %c0_8] : memref<16x128xf32, #tpu.memory_space<vmem>>, vector<16x128xf32>
    %13 = arith.truncf %11 : vector<16x128xf32> to vector<16x128xbf16>
    %c0_9 = arith.constant 0 : index
    %c0_10 = arith.constant 0 : index
    %14 = vector.load %arg5[%c0_9, %c0_10] : memref<128x128xbf16, #tpu.memory_space<vmem>>, vector<128x128xbf16>
    %cst_11 = arith.constant dense<0.000000e+00> : vector<16x128xf32>
    %15 = tpu.matmul %13, %14, %cst_11 {dimension_numbers = #tpu.dot_dimension_numbers<[1], [0], [0], [1], [0, 0, 1, 1], [], []>} : vector<16x128xbf16>, vector<128x128xbf16>, vector<16x128xf32> -> vector<16x128xf32>
    %16 = arith.addf %12, %15 : vector<16x128xf32>
    %c0_12 = arith.constant 0 : index
    %c0_13 = arith.constant 0 : index
    %17 = vector.load %arg8[%c0_12, %c0_13] : memref<16x128xf32, #tpu.memory_space<vmem>>, vector<16x128xf32>
    tpu.vector_store %arg8[%c0_12, %c0_13], %16 {strides = array<i32>} : memref<16x128xf32, #tpu.memory_space<vmem>>, vector<16x128xf32>,
    %c0_i32_14 = arith.constant 0 : i32
    %18 = arith.cmpi eq, %arg1, %c0_i32_14 : i32
    %19 = arith.extui %18 : i1 to i32
    %c0_i32_15 = arith.constant 0 : i32
    %20 = arith.cmpi ne, %19, %c0_i32_15 : i32
    scf.if %20 {
      %c0_16 = arith.constant 0 : index
      %c0_17 = arith.constant 0 : index
      %21 = vector.load %arg8[%c0_16, %c0_17] : memref<16x128xf32, #tpu.memory_space<vmem>>, vector<16x128xf32>
      %c0_18 = arith.constant 0 : index
      %c0_19 = arith.constant 0 : index
      %22 = vector.load %arg6[%c0_18, %c0_19] : memref<1x128xf32, #tpu.memory_space<vmem>>, vector<1x128xf32>
      %23 = vector.broadcast %22 : vector<1x128xf32> to vector<16x128xf32>
      %24 = arith.addf %21, %23 : vector<16x128xf32>
      %c0_20 = arith.constant 0 : index
      %c0_21 = arith.constant 0 : index
      %25 = vector.load %arg7[%c0_20, %c0_21] : memref<16x128xf32, #tpu.memory_space<vmem>>, vector<16x128xf32>
      tpu.vector_store %arg7[%c0_20, %c0_21], %24 {strides = array<i32>} : memref<16x128xf32, #tpu.memory_space<vmem>>, vector<16x128xf32>,
    } else {
    }
    return
  }
  func.func @transform_0(%arg0: i32, %arg1: i32) -> (i32, i32) {
    %c0_i32 = arith.constant 0 : i32
    %c0_i32_0 = arith.constant 0 : i32
    return %arg0, %c0_i32 : i32, i32
  }
  func.func @transform_1(%arg0: i32, %arg1: i32) -> (i32, i32) {
    %c0_i32 = arith.constant 0 : i32
    %c0_i32_0 = arith.constant 0 : i32
    return %c0_i32, %arg1 : i32, i32
  }
  func.func @transform_2(%arg0: i32, %arg1: i32) -> (i32, i32) {
    %c0_i32 = arith.constant 0 : i32
    %c0_i32_0 = arith.constant 0 : i32
    return %c0_i32, %arg1 : i32, i32
  }
  func.func @transform_3(%arg0: i32, %arg1: i32) -> (i32, i32) {
    %c0_i32 = arith.constant 0 : i32
    %c0_i32_0 = arith.constant 0 : i32
    return %arg1, %c0_i32 : i32, i32
  }
  func.func @transform_4(%arg0: i32, %arg1: i32) -> (i32, i32) {
    %c0_i32 = arith.constant 0 : i32
    %c0_i32_0 = arith.constant 0 : i32
    %c0_i32_1 = arith.constant 0 : i32
    return %c0_i32, %c0_i32_0 : i32, i32
  }
  func.func @transform_5(%arg0: i32, %arg1: i32) -> (i32, i32) {
    %c0_i32 = arith.constant 0 : i32
    %c0_i32_0 = arith.constant 0 : i32
    return %arg0, %c0_i32 : i32, i32
  }
}

</mosaic_0001>

<bundles_post_ra>
// kernel: feedforward.1
= control target key start
LH: loop header
LB: loop body
LE: loop exit
PB: predicated region body
PF: predicated region fallthrough
CT: control target
= control target key end

     0   :  { %v375_v0 = vmov 0.0   ;;  %vm376_vm0 = vmmov 0   ;;  %v47_v18 = vlaneseq  ;;  %s470_s1 = inlined_call_operand.vmem [shape: bf16[128,128], index: 1, kind: input, shape index: {}]   ;;  %s471_s3 = inlined_call_operand.vmem [shape: bf16[128,128], index: 3, kind: input, shape index: {}]   ;;  %s472_s0 = inlined_call_operand.vmem [shape: bf16[16,128], index: 0, kind: input, shape index: {}]   ;;  %s473_s2 = inlined_call_operand.vmem [shape: bf16[1,128], index: 2, kind: input, shape index: {}]   ;;  %s474_s4 = inlined_call_operand.vmem [shape: f32[1,128], index: 4, kind: input, shape index: {}]   ;;  %s475_s5 = inlined_call_operand.vmem [shape: f32[16,128], index: 5, kind: output, shape index: {}]  }
   0x1   :  { %316 = vmatprep.subr.bf16.mxu0 %v375_v0  ;;  %v358_v1 = vld [vmem:[%s470_s1 + $0x38] sm:$0xff]   ;;  %332 = vmatprep.mubr.msk.bf16.mxu0 %vm376_vm0, %v375_v0  ;;  %v359_v2 = vld [vmem:[%s470_s1 + $0x30] sm:$0xff]   ;;  %v360_v3 = vld [vmem:[%s470_s1 + $0x28] sm:$0xff]  }
   0x2   :  { %336 = vmatprep.subr.bf16.mxu1 %v375_v0  ;;  %352 = vmatprep.mubr.msk.bf16.mxu1 %vm376_vm0, %v375_v0  ;;  %v367_v4 = vld [vmem:[%s471_s3 + $0x38] sm:$0xff]   ;;  %v361_v5 = vld [vmem:[%s470_s1 + $0x20] sm:$0xff]   ;;  %v368_v6 = vld [vmem:[%s471_s3 + $0x30] sm:$0xff]   ;;  %v48_v19 = vshrl.u32 %v47_v18, 7 }
   0x3   :  { %317 = vmatpush3.bf16.msra.mxu0 %v358_v1  ;;  %337 = vmatpush3.bf16.msra.mxu1 %v367_v4  ;;  %v362_v7 = vld [vmem:[%s470_s1 + $0x18] sm:$0xff]   ;;  %v369_v8 = vld [vmem:[%s471_s3 + $0x28] sm:$0xff]   ;;  %v363_v9 = vld [vmem:[%s470_s1 + $0x10] sm:$0xff]  }
   0x4   :  { %318 = vmatprep.subr.bf16.mxu0 %v375_v0  ;;  %338 = vmatprep.subr.bf16.mxu1 %v375_v0  ;;  %v370_v10 = vld [vmem:[%s471_s3 + $0x20] sm:$0xff]   ;;  %v364_v11 = vld [vmem:[%s470_s1 + $0x8] sm:$0xff]   ;;  %v371_v12 = vld [vmem:[%s471_s3 + $0x18] sm:$0xff]   ;;  %v49_v22 = vsub.s32 0, %v48_v19 }
   0x5   :  { %v365_v13 = vld [vmem:[%s470_s1] sm:$0xff]   ;;  %v372_v15 = vld [vmem:[%s471_s3 + $0x10] sm:$0xff]   ;;  %v373_v16 = vld [vmem:[%s471_s3 + $0x8] sm:$0xff]  }
   0x6   :  { %v366_v14 = vld [vmem:[%s472_s0] sm:$0xff]  }
   0x7   :  { %319 = vmatpush3.bf16.msra.mxu0 %v359_v2  ;;  %339 = vmatpush3.bf16.msra.mxu1 %v368_v6  ;;  %v374_v17 = vld [vmem:[%s471_s3] sm:$0xff]  }
   0x8   :  { %320 = vmatprep.subr.bf16.mxu0 %v375_v0  ;;  %340 = vmatprep.subr.bf16.mxu1 %v375_v0  ;;  %v45_v20 = vld [vmem:[%s473_s2] sm:$0x1] }
   0x9   :  { %v46_v21 = vunpack.c.l.bf16 %v45_v20  ;;  %v297_v33 = vld [vmem:[%s474_s4] ss:$0 sm:$0xff] }
   0xb   :  { %321 = vmatpush3.bf16.msra.mxu0 %v360_v3  ;;  %341 = vmatpush3.bf16.msra.mxu1 %v369_v8  ;;  %v50_v23 = vrot.slane %v46_v21, %v49_v22 }
   0xc   :  { %322 = vmatprep.subr.bf16.mxu0 %v375_v0  ;;  %342 = vmatprep.subr.bf16.mxu1 %v375_v0 }
   0xf   :  { %323 = vmatpush3.bf16.msra.mxu0 %v361_v5  ;;  %343 = vmatpush3.bf16.msra.mxu1 %v370_v10 }
  0x10   :  { %324 = vmatprep.subr.bf16.mxu0 %v375_v0  ;;  %344 = vmatprep.subr.bf16.mxu1 %v375_v0 }
  0x13   :  { %325 = vmatpush3.bf16.msra.mxu0 %v362_v7  ;;  %345 = vmatpush3.bf16.msra.mxu1 %v371_v12 }
  0x14   :  { %326 = vmatprep.subr.bf16.mxu0 %v375_v0  ;;  %346 = vmatprep.subr.bf16.mxu1 %v375_v0 }
  0x17   :  { %327 = vmatpush3.bf16.msra.mxu0 %v363_v9  ;;  %347 = vmatpush3.bf16.msra.mxu1 %v372_v15 }
  0x18   :  { %328 = vmatprep.subr.bf16.mxu0 %v375_v0  ;;  %348 = vmatprep.subr.bf16.mxu1 %v375_v0 }
  0x1b   :  { %329 = vmatpush3.bf16.msra.mxu0 %v364_v11  ;;  %349 = vmatpush3.bf16.msra.mxu1 %v373_v16 }
  0x1c   :  { %330 = vmatprep.subr.bf16.mxu0 %v375_v0  ;;  %350 = vmatprep.subr.bf16.mxu1 %v375_v0 }
  0x1f   :  { %331 = vmatpush3.bf16.msra.mxu0 %v365_v13  ;;  %351 = vmatpush3.bf16.msra.mxu1 %v374_v17 }
  0x22   :  { %333 = vmatmul.mubr.bf16.vlgmr.msra.gmra.mxu0 %v366_v14 }
  0xe2   :  { %v139_v24 = vpop.f32.mrf.mxu0 }
  0xe3   :  { %v140_v26 = vadd.f32 %v139_v24, %v50_v23 }
  0xe4   :  { %v334_v25 = vpop.f32.mrf.mxu0 }
  0xe5   :  { %v146_v30 = vmax.f32 %v140_v26, 0.0 }
  0xe6   :  { %v142_v27 = vpop.f32.mrf.mxu0 }
  0xe7   :  { %v143_v28 = vadd.f32 %v142_v27, %v50_v23 }
  0xe8   :  { %v335_v29 = vpop.f32.mrf.mxu0 }
  0xe9   :  { %v147_v31 = vmax.f32 %v143_v28, 0.0 }
  0xeb   :  { %v150_v32 = vpack.c.bf16 %v147_v31, %v146_v30 }
  0xed   :  { %353 = vmatmul.mubr.bf16.vlgmr.msra.gmra.mxu1 %v150_v32 }
 0x1ad   :  { %v249_v34 = vpop.f32.mrf.mxu1 }
 0x1ae   :  { %v272_v35 = vadd.f32 %v297_v33, %v249_v34 }
 0x1af   :  { %v354_v36 = vpop.f32.mrf.mxu1 }
 0x1b0   :  { %274 = vst [vmem:[%s475_s5] sm:$0xff] %v272_v35 }
 0x1b1   :  { %v252_v37 = vpop.f32.mrf.mxu1 }
 0x1b2   :  { %v273_v38 = vadd.f32 %v297_v33, %v252_v37 }
 0x1b3   :  { %v355_v39 = vpop.f32.mrf.mxu1 }
 0x1b4   :  { %275 = vst [vmem:[%s475_s5 + $0x8] sm:$0xff] %v273_v38 }

</bundles_post_ra>
